<compile_context>
chip_gen: v7x
topology: tpu7x:2x2x1
jax: 0.10.0
libtpu: 0.0.40
codegen_flags: <defaults>
</compile_context>

<pallas_src>
import jax
import jax.numpy as jnp
from jax.experimental import pallas as pl
from jax.experimental.pallas import tpu as pltpu

EPS = 1e-5  # PyTorch BatchNorm1d default eps

_HIDDEN = (60, 65, 300)        # module hidden widths
_HIDDEN_PAD = (128, 128, 384)  # lane-aligned hidden widths


def _round_up(n, m=128):
    return ((n + m - 1) // m) * m


def _pad2d(a, shape):
    """Zero-pad a 2-D array up to `shape`."""
    return jnp.pad(a, [(0, t - s) for s, t in zip(a.shape, shape)])


def shallow_decoder_kernel(x_ref,
                           w1_ref, b1_ref,
                           w2_ref, b2_ref,
                           w3_ref, b3_ref,
                           w4_ref, b4_ref,
                           o_ref):
    batch = x_ref.shape[0]
    inv_b = 1.0 / batch

    def linear(h, w_ref, b_ref):
        return jnp.dot(h, w_ref[...], preferred_element_type=jnp.float32) + b_ref[...]

    def relu_bn(h):
        # ReLU + training-mode BatchNorm1d (gamma=1, beta=0) with one-pass
        # statistics: mean = s1/B, var = s2/B - mean^2 (biased, as PyTorch).
        # TODO(synk): for large batch tiles, offload s1/s2 to the MXU via
        #   ones(1, B) @ [h, h*h] so the scarce XLU stays free.
        h = jnp.maximum(h, 0.0)
        s1 = jnp.sum(h, axis=0, keepdims=True)
        s2 = jnp.sum(h * h, axis=0, keepdims=True)
        mean = s1 * inv_b
        var = jnp.maximum(s2 * inv_b - mean * mean, 0.0)
        return (h - mean) * jax.lax.rsqrt(var + EPS)

    h = relu_bn(linear(x_ref[...], w1_ref, b1_ref))
    h = relu_bn(linear(h, w2_ref, b2_ref))
    h = relu_bn(linear(h, w3_ref, b3_ref))
    o_ref[...] = linear(h, w4_ref, b4_ref).astype(o_ref.dtype)


def shallow_decoder_forward(x, params):
    """Pad to lane-aligned widths, run the kernel, slice off output padding."""
    batch, n_sensors = x.shape
    out_size = params["w4"].shape[1]

    in_pad = _round_up(n_sensors)
    out_pad = _round_up(out_size)
    h1, h2, h3 = _HIDDEN_PAD

    # Lane-align everything with zeros (exact: zero weight rows/cols and zero
    # biases keep padded activation columns at 0 through ReLU and BN).
    # For production, pre-pad the params once instead of per call.
    xp = _pad2d(x.astype(jnp.float32), (batch, in_pad))
    w1 = _pad2d(params["w1"], (in_pad, h1))
    b1 = _pad2d(params["b1"], (1, h1))
    w2 = _pad2d(params["w2"], (h1, h2))
    b2 = _pad2d(params["b2"], (1, h2))
    w3 = _pad2d(params["w3"], (h2, h3))
    b3 = _pad2d(params["b3"], (1, h3))
    w4 = _pad2d(params["w4"], (h3, out_pad))
    b4 = _pad2d(params["b4"], (1, out_pad))

    # Explicit scoped-VMEM budget: activations + weights, 2x headroom for
    # Pallas buffers/temporaries, capped at v7x's 64 MiB physical VMEM.
    act_bytes = 4 * batch * (in_pad + h1 + h2 + h3 + out_pad)
    wt_bytes = 4 * (in_pad * h1 + h1 * h2 + h2 * h3 + h3 * out_pad
                    + h1 + h2 + h3 + out_pad)
    vmem_limit = int(min(max(2 * (act_bytes + wt_bytes) + (8 << 20), 32 << 20),
                         64 << 20))
    # TODO(synk): if 2*(act+wt) exceeds ~64 MiB (v7x) the whole-batch block no
    # longer fits; restructure into a batch-tiled grid with two-pass BN
    # (pass 1 accumulates s1/s2 over an 'arbitrary' batch axis, pass 2
    # normalizes + next linear on a 'parallel' axis across the 2 TCs) and
    # optionally stream x/weights/output as bf16 to halve HBM traffic.

    args = (xp, w1, b1, w2, b2, w3, b3, w4, b4)
    vmem_spec = pl.BlockSpec(memory_space=pltpu.MemorySpace.VMEM)
    out_padded = pl.pallas_call(
        shallow_decoder_kernel,
        out_shape=jax.ShapeDtypeStruct((batch, out_pad), jnp.float32),
        in_specs=[vmem_spec] * len(args),
        out_specs=vmem_spec,
        compiler_params=pltpu.CompilerParams(vmem_limit_bytes=vmem_limit),
    )(*args)
    return out_padded[:, :out_size].astype(x.dtype)


def init_params(key, n_sensors, outputlayer_size):
    """xavier_normal_ weights (as in the PyTorch module), zero biases.

    Weights are stored transposed, i.e. shape (fan_in, fan_out), unpadded.
    """
    sizes = [(n_sensors, _HIDDEN[0]), (_HIDDEN[0], _HIDDEN[1]),
             (_HIDDEN[1], _HIDDEN[2]), (_HIDDEN[2], outputlayer_size)]
    params = {}
    keys = jax.random.split(key, len(sizes))
    for i, ((fan_in, fan_out), k) in enumerate(zip(sizes, keys), start=1):
        std = (2.0 / (fan_in + fan_out)) ** 0.5
        params[f"w{i}"] = std * jax.random.normal(k, (fan_in, fan_out), jnp.float32)
        params[f"b{i}"] = jnp.zeros((1, fan_out), jnp.float32)
    return params


def reference_forward(x, params):
    """Pure-JAX reference (two-pass BN stats) for verification."""
    def relu_bn(h):
        h = jnp.maximum(h, 0.0)
        mean = jnp.mean(h, axis=0, keepdims=True)
        var = jnp.mean(jnp.square(h - mean), axis=0, keepdims=True)
        return (h - mean) / jnp.sqrt(var + EPS)

    h = relu_bn(x @ params["w1"] + params["b1"])
    h = relu_bn(h @ params["w2"] + params["b2"])
    h = relu_bn(h @ params["w3"] + params["b3"])
    return h @ params["w4"] + params["b4"]


if __name__ == "__main__":
    batch = 8
    n_sensors = 32
    outputlayer_size = 200  # not a multiple of 128 -> exercises output padding

    key = jax.random.PRNGKey(0)
    k_x, k_p = jax.random.split(key)
    x = jax.random.normal(k_x, (batch, n_sensors), jnp.float32)
    params = init_params(k_p, n_sensors, outputlayer_size)

    out = shallow_decoder_forward(x, params)
    out = jax.block_until_ready(out)

    ref = reference_forward(x, params)
    assert out.shape == (batch, outputlayer_size)
    assert jnp.allclose(out, ref, atol=1e-4, rtol=1e-4)

    print("KERNEL_OK")
</pallas_src>

<mosaic_0001>
module attributes {stable_mosaic.version = 11 : i64} {
  func.func @shallow_decoder_kernel(%arg0: memref<8x128xf32, #tpu.memory_space<vmem>>, %arg1: memref<128x128xf32, #tpu.memory_space<vmem>>, %arg2: memref<1x128xf32, #tpu.memory_space<vmem>>, %arg3: memref<128x128xf32, #tpu.memory_space<vmem>>, %arg4: memref<1x128xf32, #tpu.memory_space<vmem>>, %arg5: memref<128x384xf32, #tpu.memory_space<vmem>>, %arg6: memref<1x384xf32, #tpu.memory_space<vmem>>, %arg7: memref<384x256xf32, #tpu.memory_space<vmem>>, %arg8: memref<1x256xf32, #tpu.memory_space<vmem>>, %arg9: memref<8x256xf32, #tpu.memory_space<vmem>>) attributes {dimension_semantics = [], scalar_prefetch = 0 : i64, scratch_operands = 0 : i64, tpu.core_type = #tpu.core_type<tc>} {
    %c0 = arith.constant 0 : index
    %c0_0 = arith.constant 0 : index
    %0 = vector.load %arg0[%c0, %c0_0] : memref<8x128xf32, #tpu.memory_space<vmem>>, vector<8x128xf32>
    %c0_1 = arith.constant 0 : index
    %c0_2 = arith.constant 0 : index
    %1 = vector.load %arg1[%c0_1, %c0_2] : memref<128x128xf32, #tpu.memory_space<vmem>>, vector<128x128xf32>
    %cst = arith.constant dense<0.000000e+00> : vector<8x128xf32>
    %2 = tpu.matmul %0, %1, %cst {dimension_numbers = #tpu.dot_dimension_numbers<[1], [0], [0], [1], [0, 0, 1, 1], [], []>} : vector<8x128xf32>, vector<128x128xf32>, vector<8x128xf32> -> vector<8x128xf32>
    %c0_3 = arith.constant 0 : index
    %c0_4 = arith.constant 0 : index
    %3 = vector.load %arg2[%c0_3, %c0_4] : memref<1x128xf32, #tpu.memory_space<vmem>>, vector<1x128xf32>
    %4 = vector.broadcast %3 : vector<1x128xf32> to vector<8x128xf32>
    %5 = arith.addf %2, %4 : vector<8x128xf32>
    %cst_5 = arith.constant 0.000000e+00 : f32
    %6 = vector.broadcast %cst_5 : f32 to vector<8x128xf32>
    %7 = arith.maximumf %5, %6 : vector<8x128xf32>
    %cst_6 = arith.constant dense<0.000000e+00> : vector<128xf32>
    %8 = vector.multi_reduction <add>, %7, %cst_6 [0] : vector<8x128xf32> to vector<128xf32>
    %9 = vector.shape_cast %8 : vector<128xf32> to vector<1x128xf32>
    %10 = arith.mulf %7, %7 : vector<8x128xf32>
    %cst_7 = arith.constant dense<0.000000e+00> : vector<128xf32>
    %11 = vector.multi_reduction <add>, %10, %cst_7 [0] : vector<8x128xf32> to vector<128xf32>
    %12 = vector.shape_cast %11 : vector<128xf32> to vector<1x128xf32>
    %cst_8 = arith.constant 1.250000e-01 : f32
    %13 = vector.broadcast %cst_8 : f32 to vector<1x128xf32>
    %14 = arith.mulf %9, %13 : vector<1x128xf32>
    %cst_9 = arith.constant 1.250000e-01 : f32
    %15 = vector.broadcast %cst_9 : f32 to vector<1x128xf32>
    %16 = arith.mulf %12, %15 : vector<1x128xf32>
    %17 = arith.mulf %14, %14 : vector<1x128xf32>
    %18 = arith.subf %16, %17 : vector<1x128xf32>
    %cst_10 = arith.constant 0.000000e+00 : f32
    %19 = vector.broadcast %cst_10 : f32 to vector<1x128xf32>
    %20 = arith.maximumf %18, %19 : vector<1x128xf32>
    %21 = vector.broadcast %14 : vector<1x128xf32> to vector<8x128xf32>
    %22 = arith.subf %7, %21 : vector<8x128xf32>
    %cst_11 = arith.constant 9.99999974E-6 : f32
    %23 = vector.broadcast %cst_11 : f32 to vector<1x128xf32>
    %24 = arith.addf %20, %23 : vector<1x128xf32>
    %25 = math.rsqrt %24 : vector<1x128xf32>
    %26 = vector.broadcast %25 : vector<1x128xf32> to vector<8x128xf32>
    %27 = arith.mulf %22, %26 : vector<8x128xf32>
    %c0_12 = arith.constant 0 : index
    %c0_13 = arith.constant 0 : index
    %28 = vector.load %arg3[%c0_12, %c0_13] : memref<128x128xf32, #tpu.memory_space<vmem>>, vector<128x128xf32>
    %cst_14 = arith.constant dense<0.000000e+00> : vector<8x128xf32>
    %29 = tpu.matmul %27, %28, %cst_14 {dimension_numbers = #tpu.dot_dimension_numbers<[1], [0], [0], [1], [0, 0, 1, 1], [], []>} : vector<8x128xf32>, vector<128x128xf32>, vector<8x128xf32> -> vector<8x128xf32>
    %c0_15 = arith.constant 0 : index
    %c0_16 = arith.constant 0 : index
    %30 = vector.load %arg4[%c0_15, %c0_16] : memref<1x128xf32, #tpu.memory_space<vmem>>, vector<1x128xf32>
    %31 = vector.broadcast %30 : vector<1x128xf32> to vector<8x128xf32>
    %32 = arith.addf %29, %31 : vector<8x128xf32>
    %cst_17 = arith.constant 0.000000e+00 : f32
    %33 = vector.broadcast %cst_17 : f32 to vector<8x128xf32>
    %34 = arith.maximumf %32, %33 : vector<8x128xf32>
    %cst_18 = arith.constant dense<0.000000e+00> : vector<128xf32>
    %35 = vector.multi_reduction <add>, %34, %cst_18 [0] : vector<8x128xf32> to vector<128xf32>
    %36 = vector.shape_cast %35 : vector<128xf32> to vector<1x128xf32>
    %37 = arith.mulf %34, %34 : vector<8x128xf32>
    %cst_19 = arith.constant dense<0.000000e+00> : vector<128xf32>
    %38 = vector.multi_reduction <add>, %37, %cst_19 [0] : vector<8x128xf32> to vector<128xf32>
    %39 = vector.shape_cast %38 : vector<128xf32> to vector<1x128xf32>
    %cst_20 = arith.constant 1.250000e-01 : f32
    %40 = vector.broadcast %cst_20 : f32 to vector<1x128xf32>
    %41 = arith.mulf %36, %40 : vector<1x128xf32>
    %cst_21 = arith.constant 1.250000e-01 : f32
    %42 = vector.broadcast %cst_21 : f32 to vector<1x128xf32>
    %43 = arith.mulf %39, %42 : vector<1x128xf32>
    %44 = arith.mulf %41, %41 : vector<1x128xf32>
    %45 = arith.subf %43, %44 : vector<1x128xf32>
    %cst_22 = arith.constant 0.000000e+00 : f32
    %46 = vector.broadcast %cst_22 : f32 to vector<1x128xf32>
    %47 = arith.maximumf %45, %46 : vector<1x128xf32>
    %48 = vector.broadcast %41 : vector<1x128xf32> to vector<8x128xf32>
    %49 = arith.subf %34, %48 : vector<8x128xf32>
    %cst_23 = arith.constant 9.99999974E-6 : f32
    %50 = vector.broadcast %cst_23 : f32 to vector<1x128xf32>
    %51 = arith.addf %47, %50 : vector<1x128xf32>
    %52 = math.rsqrt %51 : vector<1x128xf32>
    %53 = vector.broadcast %52 : vector<1x128xf32> to vector<8x128xf32>
    %54 = arith.mulf %49, %53 : vector<8x128xf32>
    %c0_24 = arith.constant 0 : index
    %c0_25 = arith.constant 0 : index
    %55 = vector.load %arg5[%c0_24, %c0_25] : memref<128x384xf32, #tpu.memory_space<vmem>>, vector<128x384xf32>
    %cst_26 = arith.constant dense<0.000000e+00> : vector<8x384xf32>
    %56 = tpu.matmul %54, %55, %cst_26 {dimension_numbers = #tpu.dot_dimension_numbers<[1], [0], [0], [1], [0, 0, 1, 1], [], []>} : vector<8x128xf32>, vector<128x384xf32>, vector<8x384xf32> -> vector<8x384xf32>
    %c0_27 = arith.constant 0 : index
    %c0_28 = arith.constant 0 : index
    %57 = vector.load %arg6[%c0_27, %c0_28] : memref<1x384xf32, #tpu.memory_space<vmem>>, vector<1x384xf32>
    %58 = vector.broadcast %57 : vector<1x384xf32> to vector<8x384xf32>
    %59 = arith.addf %56, %58 : vector<8x384xf32>
    %cst_29 = arith.constant 0.000000e+00 : f32
    %60 = vector.broadcast %cst_29 : f32 to vector<8x384xf32>
    %61 = arith.maximumf %59, %60 : vector<8x384xf32>
    %cst_30 = arith.constant dense<0.000000e+00> : vector<384xf32>
    %62 = vector.multi_reduction <add>, %61, %cst_30 [0] : vector<8x384xf32> to vector<384xf32>
    %63 = vector.shape_cast %62 : vector<384xf32> to vector<1x384xf32>
    %64 = arith.mulf %61, %61 : vector<8x384xf32>
    %cst_31 = arith.constant dense<0.000000e+00> : vector<384xf32>
    %65 = vector.multi_reduction <add>, %64, %cst_31 [0] : vector<8x384xf32> to vector<384xf32>
    %66 = vector.shape_cast %65 : vector<384xf32> to vector<1x384xf32>
    %cst_32 = arith.constant 1.250000e-01 : f32
    %67 = vector.broadcast %cst_32 : f32 to vector<1x384xf32>
    %68 = arith.mulf %63, %67 : vector<1x384xf32>
    %cst_33 = arith.constant 1.250000e-01 : f32
    %69 = vector.broadcast %cst_33 : f32 to vector<1x384xf32>
    %70 = arith.mulf %66, %69 : vector<1x384xf32>
    %71 = arith.mulf %68, %68 : vector<1x384xf32>
    %72 = arith.subf %70, %71 : vector<1x384xf32>
    %cst_34 = arith.constant 0.000000e+00 : f32
    %73 = vector.broadcast %cst_34 : f32 to vector<1x384xf32>
    %74 = arith.maximumf %72, %73 : vector<1x384xf32>
    %75 = vector.broadcast %68 : vector<1x384xf32> to vector<8x384xf32>
    %76 = arith.subf %61, %75 : vector<8x384xf32>
    %cst_35 = arith.constant 9.99999974E-6 : f32
    %77 = vector.broadcast %cst_35 : f32 to vector<1x384xf32>
    %78 = arith.addf %74, %77 : vector<1x384xf32>
    %79 = math.rsqrt %78 : vector<1x384xf32>
    %80 = vector.broadcast %79 : vector<1x384xf32> to vector<8x384xf32>
    %81 = arith.mulf %76, %80 : vector<8x384xf32>
    %c0_36 = arith.constant 0 : index
    %c0_37 = arith.constant 0 : index
    %82 = vector.load %arg7[%c0_36, %c0_37] : memref<384x256xf32, #tpu.memory_space<vmem>>, vector<384x256xf32>
    %cst_38 = arith.constant dense<0.000000e+00> : vector<8x256xf32>
    %83 = tpu.matmul %81, %82, %cst_38 {dimension_numbers = #tpu.dot_dimension_numbers<[1], [0], [0], [1], [0, 0, 1, 1], [], []>} : vector<8x384xf32>, vector<384x256xf32>, vector<8x256xf32> -> vector<8x256xf32>
    %c0_39 = arith.constant 0 : index
    %c0_40 = arith.constant 0 : index
    %84 = vector.load %arg8[%c0_39, %c0_40] : memref<1x256xf32, #tpu.memory_space<vmem>>, vector<1x256xf32>
    %85 = vector.broadcast %84 : vector<1x256xf32> to vector<8x256xf32>
    %86 = arith.addf %83, %85 : vector<8x256xf32>
    %c0_41 = arith.constant 0 : index
    %c0_42 = arith.constant 0 : index
    %87 = vector.load %arg9[%c0_41, %c0_42] : memref<8x256xf32, #tpu.memory_space<vmem>>, vector<8x256xf32>
    tpu.vector_store %arg9[%c0_41, %c0_42], %86 {strides = array<i32>} : memref<8x256xf32, #tpu.memory_space<vmem>>, vector<8x256xf32>,
    return
  }
}

</mosaic_0001>

<bundles_post_ra>
// kernel: tpu_custom_call.1
= control target key start
LH: loop header
LB: loop body
LE: loop exit
PB: predicated region body
PF: predicated region fallthrough
CT: control target
= control target key end

     0   :  { %14 = vsyncpa [#allocation3], 0  ;;  %s1636_s0 = inlined_call_operand.hbm [shape: f32[8,128], index: 0, kind: input, shape index: {}]   ;;  %s1637_s1 = inlined_call_operand.hbm [shape: f32[128,128], index: 1, kind: input, shape index: {}]   ;;  %s1638_s2 = inlined_call_operand.vmem [shape: f32[1,128], index: 2, kind: input, shape index: {}]   ;;  %s1639_s3 = inlined_call_operand.hbm [shape: f32[128,128], index: 3, kind: input, shape index: {}]   ;;  %s1640_s4 = inlined_call_operand.vmem [shape: f32[1,128], index: 4, kind: input, shape index: {}]   ;;  %s1641_s5 = inlined_call_operand.hbm [shape: f32[128,384], index: 5, kind: input, shape index: {}]   ;;  %s1642_s6 = inlined_call_operand.vmem [shape: f32[1,384], index: 6, kind: input, shape index: {}]   ;;  %s1643_s7 = inlined_call_operand.hbm [shape: f32[384,256], index: 7, kind: input, shape index: {}]   ;;  %s1644_s8 = inlined_call_operand.vmem [shape: f32[1,256], index: 8, kind: input, shape index: {}]   ;;  %s1645_s9 = inlined_call_operand.hbm [shape: f32[8,256], index: 9, kind: output, shape index: {}]  }
   0x1   :  { %15 = vsyncpa [#allocation6], 0 }
   0x2   :  { %16 = vsyncpa [#allocation9], 0 }
   0x3   :  { %17 = vsyncpa [#allocation4], 0  ;;  %s1403_s30 = smov [#allocation5]   ;;  %s1263_s13 = scalar_lea.hbm %s1637_s1, 2048 }
   0x4   :  { %s33_s10 = sshll.u32 %s1403_s30, 4  ;;  %p1264_p0 = scmp.ne.s32.totalorder %s1637_s1, %s1263_s13  ;;  %s34_s10 = int_to_ptr.vmem [resolvable:$true] %s33_s10 }
   0x5   :  { %p1267_p1 = scmp.lt.u32.totalorder %s1263_s13, %s1637_s1 }
   0x7   :  { %p1269_p2 = pnand %p1267_p1, %p1264_p0 }
   0x9   :  { %1272 = shalt.err (!%p1269_p2)
}
   0xa   :  { %s1273_s18 = scalar_lea.vmem %s34_s10, 2048  ;;  %p1278_p4 = scmp.lt.s32.totalorder %s34_s10, %s34_s10 }
   0xb   :  { %p1274_p3 = scmp.ne.s32.totalorder %s34_s10, %s1273_s18  ;;  %p1279_p5 = scmp.lt.s32.totalorder %s1273_s18, %s1273_s18 }
   0xd   :  { %p1280_p6 = por %p1279_p5, %p1278_p4 }
   0xf   :  { %p1281_p7 = pnand %p1280_p6, %p1274_p3 }
  0x11   :  { %1284 = shalt.err (!%p1281_p7)
}
  0x12   :  { %s1404_s19 = smov 128   ;;  %s1405_s20 = smov 8  }
  0x13   :  { %39 = dma.hbm_to_vmem [thread:$0]  %s1637_s1, 2048, %s34_s10, [#allocation6], %s1404_s19, %s1404_s19, %s1405_s20  }
  0x14   :  { %s1406_s23 = smov [#allocation8]   ;;  %s1285_s27 = scalar_lea.hbm %s1641_s5, 6144 }
  0x15   :  { %s61_s24 = sshll.u32 %s1406_s23, 4  ;;  %p1286_p8 = scmp.ne.s32.totalorder %s1641_s5, %s1285_s27  ;;  %s62_s24 = int_to_ptr.vmem [resolvable:$true] %s61_s24 }
  0x16   :  { %p1289_p9 = scmp.lt.u32.totalorder %s1285_s27, %s1641_s5 }
  0x18   :  { %p1291_p10 = pnand %p1289_p9, %p1286_p8 }
  0x1a   :  { %1294 = shalt.err (!%p1291_p10)
}
  0x1b   :  { %s1295_s12 = scalar_lea.vmem %s62_s24, 6144  ;;  %p1300_p12 = scmp.lt.s32.totalorder %s62_s24, %s62_s24 }
  0x1c   :  { %p1296_p11 = scmp.ne.s32.totalorder %s62_s24, %s1295_s12  ;;  %p1301_p13 = scmp.lt.s32.totalorder %s1295_s12, %s1295_s12 }
  0x1e   :  { %p1302_p0 = por %p1301_p13, %p1300_p12 }
  0x20   :  { %p1303_p1 = pnand %p1302_p0, %p1296_p11 }
  0x22   :  { %1306 = shalt.err (!%p1303_p1)
}
  0x23   :  { %s1407_s1 = smov 384   ;;  %s1408_s10 = smov 24  }
  0x24   :  { %67 = dma.hbm_to_vmem [thread:$0]  %s1641_s5, 6144, %s62_s24, [#allocation9], %s1407_s1, %s1407_s1, %s1408_s10  }
  0x25   :  { %s1409_s15 = smov [#allocation2]   ;;  %s1410_s17 = smov [#allocation7]  }
  0x26   :  { %s24_s16 = sshll.u32 %s1409_s15, 4  ;;  %s47_s18 = sshll.u32 %s1410_s17, 4  ;;  %s25_s16 = int_to_ptr.vmem [resolvable:$true] %s24_s16  ;;  %s1495_s18 = int_to_ptr.vmem [resolvable:$true] %s47_s18 }
  0x27   :  { %s1307_s23 = scalar_lea.hbm %s1636_s0, 128 }
  0x28   :  { %p1308_p2 = scmp.ne.s32.totalorder %s1636_s0, %s1307_s23  ;;  %p1311_p3 = scmp.lt.u32.totalorder %s1307_s23, %s1636_s0 }
  0x2a   :  { %p1313_p4 = pnand %p1311_p3, %p1308_p2 }
  0x2c   :  { %1316 = shalt.err (!%p1313_p4)
}
  0x2d   :  { %s1317_s5 = scalar_lea.vmem %s25_s16, 128  ;;  %p1322_p6 = scmp.lt.s32.totalorder %s25_s16, %s25_s16 }
  0x2e   :  { %p1318_p5 = scmp.ne.s32.totalorder %s25_s16, %s1317_s5  ;;  %p1323_p7 = scmp.lt.s32.totalorder %s1317_s5, %s1317_s5 }
  0x30   :  { %p1324_p8 = por %p1323_p7, %p1322_p6 }
  0x32   :  { %p1325_p9 = pnand %p1324_p8, %p1318_p5 }
  0x34   :  { %1328 = shalt.err (!%p1325_p9)
}
  0x35   :  { %27 = dma.hbm_to_vmem [thread:$0]  %s1636_s0, 128, %s25_s16, [#allocation3]  }
  0x36   :  { %s1329_s12 = scalar_lea.hbm %s1639_s3, 2048 }
  0x37   :  { %p1330_p10 = scmp.ne.s32.totalorder %s1639_s3, %s1329_s12  ;;  %p1333_p11 = scmp.lt.u32.totalorder %s1329_s12, %s1639_s3 }
  0x39   :  { %p1335_p12 = pnand %p1333_p11, %p1330_p10 }
  0x3b   :  { %1338 = shalt.err (!%p1335_p12)
}
  0x3c   :  { %s1339_s15 = scalar_lea.vmem %s1495_s18, 2048  ;;  %p1344_p0 = scmp.lt.s32.totalorder %s1495_s18, %s1495_s18 }
  0x3d   :  { %p1340_p13 = scmp.ne.s32.totalorder %s1495_s18, %s1339_s15  ;;  %p1345_p1 = scmp.lt.s32.totalorder %s1339_s15, %s1339_s15 }
  0x3f   :  { %p1346_p2 = por %p1345_p1, %p1344_p0 }
  0x41   :  { %p1347_p3 = pnand %p1346_p2, %p1340_p13 }
  0x43   :  { %1350 = shalt.err (!%p1347_p3)
}
  0x44   :  { %53 = dma.hbm_to_vmem [thread:$0]  %s1639_s3, 2048, %s1495_s18, [#allocation6], %s1404_s19, %s1404_s19, %s1405_s20  }
  0x45   :  { %s1411_s17 = smov [#allocation10]   ;;  %s1351_s25 = scalar_lea.hbm %s1643_s7, 12288 }
  0x46   :  { %s75_s21 = sshll.u32 %s1411_s17, 4  ;;  %p1352_p4 = scmp.ne.s32.totalorder %s1643_s7, %s1351_s25  ;;  %s76_s21 = int_to_ptr.vmem [resolvable:$true] %s75_s21 }
  0x47   :  { %p1355_p5 = scmp.lt.u32.totalorder %s1351_s25, %s1643_s7 }
  0x49   :  { %p1357_p6 = pnand %p1355_p5, %p1352_p4 }
  0x4b   :  { %1360 = shalt.err (!%p1357_p6)
}
  0x4c   :  { %s1361_s24 = scalar_lea.vmem %s76_s21, 12288  ;;  %p1366_p8 = scmp.lt.s32.totalorder %s76_s21, %s76_s21 }
  0x4d   :  { %p1362_p7 = scmp.ne.s32.totalorder %s76_s21, %s1361_s24  ;;  %p1367_p9 = scmp.lt.s32.totalorder %s1361_s24, %s1361_s24 }
  0x4f   :  { %p1368_p10 = por %p1367_p9, %p1366_p8 }
  0x51   :  { %p1369_p11 = pnand %p1368_p10, %p1362_p7 }
  0x53   :  { %1372 = shalt.err (!%p1369_p11)
}
  0x54   :  { %s1412_s3 = smov 256   ;;  %s1413_s19 = smov 16  }
  0x55   :  { %81 = dma.hbm_to_vmem [thread:$0]  %s1643_s7, 12288, %s76_s21, [#allocation9], %s1412_s3, %s1412_s3, %s1413_s19  }
  0x56   :  { %1395 = dma.done.wait [#allocation3], 128  }
  0x57   :  { %1396 = vsyncadd [#allocation3], 4294967168 }
  0x58   :  { %1397 = dma.done.wait [#allocation6], 4096  }
  0x59   :  { %1398 = vsyncadd [#allocation6], 4294963200 }
  0x5a   :  { %1399 = dma.done.wait [#allocation9], 18432  }
  0x5b   :  { %1400 = vsyncadd [#allocation9], 4294948864  ;;  %v1414_v0 = vmov 0.0|0.0   ;;  %vm1415_vm0 = vmmov 0   ;;  %v1416_v1 = vmov 0.0   ;;  %v100_v2 = vld [vmem:[#allocation5] sm:$0xff] }
  0x5c   :  { %1034 = vmatprep.subr.bf16.mxu1 %v1414_v0  ;;  %961 = vmatprep.mubr.msk.f32.mxu1 %vm1415_vm0, %v1416_v1  ;;  %v101_v3 = vld [vmem:[#allocation5 + $0x8] sm:$0xff]  ;;  %v102_v4 = vld [vmem:[#allocation5 + $0x10] sm:$0xff]  ;;  %v103_v6 = vld [vmem:[#allocation5 + $0x18] sm:$0xff]  ;;  %s1417_s1 = smov [#allocation11]  }
  0x5d   :  { %461 = vmatprep.mubr.f32.mxu0 %v1416_v1  ;;  %v1035_v5 = vpack.c.bf16 %v101_v3, %v100_v2  ;;  %v1038_v7 = vpack.c.bf16 %v103_v6, %v102_v4  ;;  %v104_v8 = vld [vmem:[#allocation5 + $0x20] sm:$0xff]  ;;  %v105_v9 = vld [vmem:[#allocation5 + $0x28] sm:$0xff]  ;;  %v106_v11 = vld [vmem:[#allocation5 + $0x30] sm:$0xff]  ;;  %s865_s10 = sshll.u32 %s1417_s1, 4  ;;  %s866_s10 = int_to_ptr.vmem [resolvable:$true] %s865_s10 }
  0x5e   :  { %v1041_v10 = vpack.c.bf16 %v105_v9, %v104_v8  ;;  %v107_v12 = vld [vmem:[#allocation5 + $0x38] sm:$0xff]  ;;  %v108_v14 = vld [vmem:[#allocation5 + $0x40] sm:$0xff]  ;;  %v109_v15 = vld [vmem:[#allocation5 + $0x48] sm:$0xff]  ;;  %s1373_s13 = scalar_lea.vmem %s866_s10, 256  ;;  %p1378_p13 = scmp.lt.s32.totalorder %s866_s10, %s866_s10 }
  0x5f   :  { %1036 = vmatpush3.bf16.msra.mxu1 %v1035_v5  ;;  %v1044_v13 = vpack.c.bf16 %v107_v12, %v106_v11  ;;  %v1047_v16 = vpack.c.bf16 %v109_v15, %v108_v14  ;;  %v110_v17 = vld [vmem:[#allocation5 + $0x50] sm:$0xff]  ;;  %v111_v18 = vld [vmem:[#allocation5 + $0x58] sm:$0xff]  ;;  %v112_v20 = vld [vmem:[#allocation5 + $0x60] sm:$0xff]  ;;  %p1374_p12 = scmp.ne.s32.totalorder %s866_s10, %s1373_s13  ;;  %p1379_p0 = scmp.lt.s32.totalorder %s1373_s13, %s1373_s13 }
  0x60   :  { %1037 = vmatprep.subr.bf16.mxu1 %v1414_v0  ;;  %v1050_v19 = vpack.c.bf16 %v111_v18, %v110_v17  ;;  %v113_v21 = vld [vmem:[#allocation5 + $0x68] sm:$0xff]  ;;  %v114_v23 = vld [vmem:[#allocation5 + $0x70] sm:$0xff]  ;;  %v115_v24 = vld [vmem:[#allocation5 + $0x78] sm:$0xff] }
  0x61   :  { %v1053_v22 = vpack.c.bf16 %v113_v21, %v112_v20  ;;  %v1056_v25 = vpack.c.bf16 %v115_v24, %v114_v23  ;;  %v99_v26 = vld [vmem:[#allocation2] sm:$0xff]  ;;  %v216_v27 = vld [vmem:[#allocation7] sm:$0xff]  ;;  %v217_v28 = vld [vmem:[#allocation7 + $0x8] sm:$0xff]  ;;  %p1380_p1 = por %p1379_p0, %p1378_p13 }
  0x62   :  { %v1059_v29 = vpack.c.bf16 %v217_v28, %v216_v27  ;;  %v218_v30 = vld [vmem:[#allocation7 + $0x10] sm:$0xff]  ;;  %v219_v31 = vld [vmem:[#allocation7 + $0x18] sm:$0xff]  ;;  %v220_v33 = vld [vmem:[#allocation7 + $0x20] sm:$0xff] }
  0x63   :  { %1039 = vmatpush3.bf16.msra.mxu1 %v1038_v7  ;;  %v1062_v32 = vpack.c.bf16 %v219_v31, %v218_v30  ;;  %v221_v34 = vld [vmem:[#allocation7 + $0x28] sm:$0xff]  ;;  %v222_v36 = vld [vmem:[#allocation7 + $0x30] sm:$0xff]  ;;  %v223_v37 = vld [vmem:[#allocation7 + $0x38] sm:$0xff]  ;;  %p1381_p2 = pnand %p1380_p1, %p1374_p12 }
  0x64   :  { %1040 = vmatprep.subr.bf16.mxu1 %v1414_v0  ;;  %v1065_v35 = vpack.c.bf16 %v221_v34, %v220_v33  ;;  %v1068_v38 = vpack.c.bf16 %v223_v37, %v222_v36  ;;  %v224_v39 = vld [vmem:[#allocation7 + $0x40] sm:$0xff]  ;;  %v225_v40 = vld [vmem:[#allocation7 + $0x48] sm:$0xff]  ;;  %v226_v42 = vld [vmem:[#allocation7 + $0x50] sm:$0xff] }
  0x65   :  { %v1071_v41 = vpack.c.bf16 %v225_v40, %v224_v39  ;;  %v227_v43 = vld [vmem:[#allocation7 + $0x58] sm:$0xff]  ;;  %v228_v45 = vld [vmem:[#allocation7 + $0x60] sm:$0xff]  ;;  %v229_v46 = vld [vmem:[#allocation7 + $0x68] sm:$0xff] }
  0x66   :  { %v1074_v44 = vpack.c.bf16 %v227_v43, %v226_v42  ;;  %v1077_v47 = vpack.c.bf16 %v229_v46, %v228_v45  ;;  %v230_v48 = vld [vmem:[#allocation7 + $0x70] sm:$0xff]  ;;  %v231_v49 = vld [vmem:[#allocation7 + $0x78] sm:$0xff]  ;;  %v336_v17 = vld [vmem:[#allocation8 + $0x20] sm:$0xff] }
  0x67   :  { %1042 = vmatpush3.bf16.msra.mxu1 %v1041_v10  ;;  %v1080_v50 = vpack.c.bf16 %v231_v49, %v230_v48  ;;  %v876_v51 = vld [vmem:[%s1638_s2] ss:$0 sm:$0xff]  ;;  %v334_v21 = vld [vmem:[#allocation8 + $0x10] sm:$0xff]  ;;  %v337_v23 = vld [vmem:[#allocation8 + $0x28] sm:$0xff] }
  0x68   :  { %1043 = vmatprep.subr.bf16.mxu1 %v1414_v0  ;;  %v335_v20 = vld [vmem:[#allocation8 + $0x18] sm:$0xff]  ;;  %v1115_v24 = vpack.c.bf16 %v337_v23, %v334_v21  ;;  %v338_v28 = vld [vmem:[#allocation8 + $0x30] sm:$0xff]  ;;  %v340_v30 = vld [vmem:[#allocation8 + $0x40] sm:$0xff] }
  0x69   :  { %v345_v34 = vld [vmem:[#allocation8 + $0x68] sm:$0xff]  ;;  %v344_v37 = vld [vmem:[#allocation8 + $0x60] sm:$0xff]  ;;  %v346_v39 = vld [vmem:[#allocation8 + $0x70] sm:$0xff] }
  0x6a   :  { %v351_v42 = vld [vmem:[#allocation8 + $0x98] sm:$0xff]  ;;  %v354_v43 = vld [vmem:[#allocation8 + $0xb0] sm:$0xff]  ;;  %v352_v48 = vld [vmem:[#allocation8 + $0xa0] sm:$0xff] }
  0x6b   :  { %1045 = vmatpush3.bf16.msra.mxu1 %v1044_v13  ;;  %v1094_v45 = vpack.c.bf16 %v354_v43, %v351_v42  ;;  %v350_v46 = vld [vmem:[#allocation8 + $0x90] sm:$0xff]  ;;  %v377_v21 = vld [vmem:[#allocation8 + $0x168] sm:$0xff]  ;;  %v379_v23 = vld [vmem:[#allocation8 + $0x178] sm:$0xff] }
  0x6c   :  { %1046 = vmatprep.subr.bf16.mxu1 %v1414_v0 }
  0x6f   :  { %1048 = vmatpush3.bf16.msra.mxu1 %v1047_v16  ;;  %v333_v16 = vld [vmem:[#allocation8 + $0x8] sm:$0xff] }
  0x70   :  { %1049 = vmatprep.subr.bf16.mxu1 %v1414_v0  ;;  %v1082_v18 = vpack.c.bf16 %v336_v17, %v333_v16  ;;  %v378_v16 = vld [vmem:[#allocation8 + $0x170] sm:$0xff] }
  0x72   :  { %1083 = vmatprep.subr.bf16.mxu0 %v1082_v18 }
  0x73   :  { %1051 = vmatpush3.bf16.msra.mxu1 %v1050_v19  ;;  %v332_v19 = vld [vmem:[#allocation8] sm:$0xff] }
  0x74   :  { %1052 = vmatprep.subr.bf16.mxu1 %v1414_v0 }
  0x77   :  { %1054 = vmatpush3.bf16.msra.mxu1 %v1053_v22  ;;  %v1084_v22 = vpack.c.bf16 %v335_v20, %v332_v19  ;;  %v374_v20 = vld [vmem:[#allocation8 + $0x150] sm:$0xff] }
  0x78   :  { %1055 = vmatprep.subr.bf16.mxu1 %v1414_v0 }
  0x79   :  { %1085 = vmatpush1.bf16.msra.mxu0 %v1084_v22  ;;  %v376_v22 = vld [vmem:[#allocation8 + $0x160] sm:$0xff] }
  0x7b   :  { %1057 = vmatpush3.bf16.msra.mxu1 %v1056_v25  ;;  %v339_v25 = vld [vmem:[#allocation8 + $0x38] sm:$0xff] }
  0x7c   :  { %1058 = vmatprep.subr.bf16.mxu1 %v1414_v0 }
  0x7e   :  { %962 = vmatmul.mubr.f32.vlgmr.msra.gmra.mrb[0].mxu1 %v99_v26  ;;  %v342_v26 = vld [vmem:[#allocation8 + $0x50] sm:$0xff] }
  0x7f   :  { %996 = vmatprep.mubr.msk.f32.mxu1 %vm1415_vm0, %v1416_v1  ;;  %1060 = vmatpush3.bf16.msra.mxu1 %v1059_v29  ;;  %v1086_v27 = vpack.c.bf16 %v342_v26, %v339_v25  ;;  %v341_v29 = vld [vmem:[#allocation8 + $0x48] sm:$0xff]  ;;  %v1136_v25 = vpack.c.bf16 %v379_v23, %v376_v22  ;;  %v627_v23 = vld [vmem:[#allocation10 + $0xa0] sm:$0xff] }
  0x80   :  { %1061 = vmatprep.subr.bf16.mxu1 %v1414_v0  ;;  %v1088_v31 = vpack.c.bf16 %v341_v29, %v338_v28  ;;  %v608_v26 = vld [vmem:[#allocation10 + $0x8] sm:$0xff]  ;;  %v877_v29 = vld [vmem:[%s1640_s4] ss:$0 sm:$0xff] }
  0x81   :  { %1087 = vmatprep.subr.bf16.mxu0 %v1086_v27  ;;  %v610_v27 = vld [vmem:[#allocation10 + $0x18] sm:$0xff] }
  0x82   :  { %1089 = vmatpush1.bf16.msra.mxu0 %v1088_v31  ;;  %v1138_v28 = vpack.c.bf16 %v610_v27, %v608_v26  ;;  %v632_v26 = vld [vmem:[#allocation10 + $0xc8] sm:$0xff]  ;;  %v634_v27 = vld [vmem:[#allocation10 + $0xd8] sm:$0xff] }
  0x83   :  { %1063 = vmatpush3.bf16.msra.mxu1 %v1062_v32  ;;  %v343_v32 = vld [vmem:[#allocation8 + $0x58] sm:$0xff] }
  0x84   :  { %1064 = vmatprep.subr.bf16.mxu1 %v1414_v0  ;;  %v1118_v33 = vpack.c.bf16 %v343_v32, %v340_v30 }
  0x87   :  { %1066 = vmatpush3.bf16.msra.mxu1 %v1065_v35  ;;  %v348_v35 = vld [vmem:[#allocation8 + $0x80] sm:$0xff] }
  0x88   :  { %1067 = vmatprep.subr.bf16.mxu1 %v1414_v0  ;;  %v1090_v36 = vpack.c.bf16 %v348_v35, %v345_v34 }
  0x8a   :  { %1091 = vmatprep.subr.bf16.mxu0 %v1090_v36 }
  0x8b   :  { %1069 = vmatpush3.bf16.msra.mxu1 %v1068_v38  ;;  %v347_v38 = vld [vmem:[#allocation8 + $0x78] sm:$0xff] }
  0x8c   :  { %1070 = vmatprep.subr.bf16.mxu1 %v1414_v0  ;;  %v1092_v40 = vpack.c.bf16 %v347_v38, %v344_v37 }
  0x8e   :  { %1093 = vmatpush1.bf16.msra.mxu0 %v1092_v40 }
  0x8f   :  { %1072 = vmatpush3.bf16.msra.mxu1 %v1071_v41  ;;  %v349_v41 = vld [vmem:[#allocation8 + $0x88] sm:$0xff]  ;;  %1095 = vmatprep.subr.bf16.mxu0 %v1094_v45 }
  0x90   :  { %1073 = vmatprep.subr.bf16.mxu1 %v1414_v0 }
  0x93   :  { %1075 = vmatpush3.bf16.msra.mxu1 %v1074_v44  ;;  %v1121_v44 = vpack.c.bf16 %v349_v41, %v346_v39 }
  0x94   :  { %1076 = vmatprep.subr.bf16.mxu1 %v1414_v0 }
  0x97   :  { %1078 = vmatpush3.bf16.msra.mxu1 %v1077_v47  ;;  %v353_v47 = vld [vmem:[#allocation8 + $0xa8] sm:$0xff] }
  0x98   :  { %1079 = vmatprep.subr.bf16.mxu1 %v1414_v0  ;;  %v1096_v49 = vpack.c.bf16 %v353_v47, %v350_v46 }
  0x9a   :  { %1097 = vmatpush1.bf16.msra.mxu0 %v1096_v49 }
  0x9b   :  { %1081 = vmatpush3.bf16.msra.mxu1 %v1080_v50  ;;  %v355_v50 = vld [vmem:[#allocation8 + $0xb8] sm:$0xff] }
  0x9c   :  { %1114 = vmatprep.subr.bf16.mxu1 %v1414_v0 }
 0x151   :  { %v189_v52 = vpop.f32.mrb[0].mxu1 }
 0x152   :  { %v190_v53 = vadd.f32 %v876_v51, %v189_v52  ;;  %v963_v54 = vpop.f32.mrb[1].mxu1  ;;  %v357_v51 = vld [vmem:[#allocation8 + $0xc8] sm:$0xff]  ;;  %v360_v52 = vld [vmem:[#allocation8 + $0xe0] sm:$0xff] }
 0x153   :  { %v1098_v54 = vpack.c.bf16 %v360_v52, %v357_v51  ;;  %v607_v52 = vld [vmem:[#allocation10] sm:$0xff] }
 0x154   :  { %v193_v55 = vmax.f32 %v190_v53, 0.0  ;;  %v1124_v53 = vpack.c.bf16 %v355_v50, %v352_v48 }
 0x155   :  { %1099 = vmatprep.subr.bf16.mxu0 %v1098_v54  ;;  %v612_v54 = vld [vmem:[#allocation10 + $0x28] sm:$0xff] }
 0x156   :  { %v194_v56 = vrot.slane %v193_v55, 4  ;;  %v200_v57 = vmul.f32 %v193_v55, %v193_v55 }
 0x158   :  { %v195_v58 = vadd.f32 %v194_v56, %v193_v55  ;;  %v201_v59 = vrot.slane %v200_v57, 4  ;;  %v359_v56 = vld [vmem:[#allocation8 + $0xd8] sm:$0xff] }
 0x15a   :  { %v196_v60 = vrot.slane %v195_v58, 2  ;;  %v202_v61 = vadd.f32 %v201_v59, %v200_v57  ;;  %v358_v57 = vld [vmem:[#allocation8 + $0xd0] sm:$0xff]  ;;  %v363_v59 = vld [vmem:[#allocation8 + $0xf8] sm:$0xff] }
 0x15c   :  { %v197_v62 = vadd.f32 %v196_v60, %v195_v58  ;;  %v203_v63 = vrot.slane %v202_v61, 2  ;;  %v361_v58 = vld [vmem:[#allocation8 + $0xe8] sm:$0xff]  ;;  %v366_v60 = vld [vmem:[#allocation8 + $0x110] sm:$0xff] }
 0x15e   :  { %v198_v2 = vrot.slane %v197_v62, 1  ;;  %v204_v3 = vadd.f32 %v203_v63, %v202_v61  ;;  %v1102_v63 = vpack.c.bf16 %v366_v60, %v363_v59 }
 0x160   :  { %v199_v4 = vadd.f32 %v198_v2, %v197_v62  ;;  %v205_v5 = vrot.slane %v204_v3, 1  ;;  %v1127_v62 = vpack.c.bf16 %v361_v58, %v358_v57  ;;  %v362_v2 = vld [vmem:[#allocation8 + $0xf0] sm:$0xff] }
 0x162   :  { %v206_v6 = vadd.f32 %v205_v5, %v204_v3  ;;  %v207_v7 = vmul.f32 0.125, %v199_v4  ;;  %v365_v3 = vld [vmem:[#allocation8 + $0x108] sm:$0xff]  ;;  %v364_v4 = vld [vmem:[#allocation8 + $0x100] sm:$0xff]  ;;  %v367_v5 = vld [vmem:[#allocation8 + $0x118] sm:$0xff] }
 0x164   :  { %v208_v8 = vmul.f32 0.125, %v206_v6  ;;  %v209_v9 = vmul.f32 %v207_v7, %v207_v7  ;;  %v212_v13 = vsub.f32 %v193_v55, %v207_v7  ;;  %v356_v55 = vld [vmem:[#allocation8 + $0xc0] sm:$0xff]  ;;  %v369_v6 = vld [vmem:[#allocation8 + $0x128] sm:$0xff] }
 0x165   :  { %v1100_v61 = vpack.c.bf16 %v359_v56, %v356_v55  ;;  %v372_v7 = vld [vmem:[#allocation8 + $0x140] sm:$0xff]  ;;  %v614_v55 = vld [vmem:[#allocation10 + $0x38] sm:$0xff] }
 0x166   :  { %v210_v10 = vsub.f32 %v208_v8, %v209_v9  ;;  %v1104_v8 = vpack.c.bf16 %v365_v3, %v362_v2  ;;  %v1130_v9 = vpack.c.bf16 %v367_v5, %v364_v4  ;;  %v1142_v60 = vpack.c.bf16 %v614_v55, %v612_v54  ;;  %v618_v2 = vld [vmem:[#allocation10 + $0x58] sm:$0xff]  ;;  %v615_v5 = vld [vmem:[#allocation10 + $0x40] sm:$0xff]  ;;  %v652_v55 = vld [vmem:[#allocation10 + $0x168] sm:$0xff] }
 0x167   :  { %1101 = vmatpush1.bf16.msra.mxu0 %v1100_v61  ;;  %v611_v61 = vld [vmem:[#allocation10 + $0x20] sm:$0xff] }
 0x168   :  { %v211_v11 = vmax.f32 %v210_v10, 0.0  ;;  %1103 = vmatprep.subr.bf16.mxu0 %v1102_v63  ;;  %v1106_v10 = vpack.c.bf16 %v372_v7, %v369_v6  ;;  %v616_v63 = vld [vmem:[#allocation10 + $0x48] sm:$0xff]  ;;  %v617_v6 = vld [vmem:[#allocation10 + $0x50] sm:$0xff] }
 0x169   :  { %v1146_v4 = vpack.c.bf16 %v618_v2, %v616_v63  ;;  %v620_v7 = vld [vmem:[#allocation10 + $0x68] sm:$0xff]  ;;  %v655_v2 = vld [vmem:[#allocation10 + $0x180] sm:$0xff] }
 0x16a   :  { %v213_v12 = vadd.f32 1e-05, %v211_v11  ;;  %v368_v11 = vld [vmem:[#allocation8 + $0x120] sm:$0xff] }
 0x16b   :  { %1105 = vmatpush1.bf16.msra.mxu0 %v1104_v8  ;;  %v622_v8 = vld [vmem:[#allocation10 + $0x78] sm:$0xff] }
 0x16c   :  { %1253 = vrsqrt.f32 %v213_v12  ;;  %v371_v12 = vld [vmem:[#allocation8 + $0x138] sm:$0xff]  ;;  %1107 = vmatprep.subr.bf16.mxu0 %v1106_v10  ;;  %v1150_v10 = vpack.c.bf16 %v622_v8, %v620_v7  ;;  %v659_v8 = vld [vmem:[#allocation10 + $0x1a0] sm:$0xff] }
 0x16d   :  { %v1108_v17 = vpack.c.bf16 %v371_v12, %v368_v11  ;;  %v619_v11 = vld [vmem:[#allocation10 + $0x60] sm:$0xff]  ;;  %v621_v12 = vld [vmem:[#allocation10 + $0x70] sm:$0xff] }
 0x16f   :  { %1109 = vmatpush1.bf16.msra.mxu0 %v1108_v17  ;;  %v623_v17 = vld [vmem:[#allocation10 + $0x80] sm:$0xff] }
 0x176   :  { %v1254_v14 = vpop.eup %1253 }
 0x177   :  { %v215_v15 = vmul.f32 %v1254_v14, %v212_v13  ;;  %v370_v13 = vld [vmem:[#allocation8 + $0x130] sm:$0xff]  ;;  %v373_v14 = vld [vmem:[#allocation8 + $0x148] sm:$0xff] }
 0x178   :  { %v1133_v18 = vpack.c.bf16 %v373_v14, %v370_v13  ;;  %v624_v13 = vld [vmem:[#allocation10 + $0x88] sm:$0xff]  ;;  %v626_v14 = vld [vmem:[#allocation10 + $0x98] sm:$0xff] }
 0x179   :  { %997 = vmatmul.mubr.f32.vlgmr.msra.gmra.mrb[2].mxu1 %v215_v15  ;;  %v375_v15 = vld [vmem:[#allocation8 + $0x158] sm:$0xff] }
 0x17a   :  { %1031 = vmatprep.mubr.msk.f32.mxu1 %vm1415_vm0, %v1416_v1  ;;  %1116 = vmatpush3.bf16.msra.mxu1 %v1115_v24  ;;  %v1110_v19 = vpack.c.bf16 %v378_v16, %v375_v15  ;;  %v1112_v24 = vpack.c.bf16 %v377_v21, %v374_v20  ;;  %v1152_v15 = vpack.c.bf16 %v621_v12, %v619_v11  ;;  %v630_v20 = vld [vmem:[#allocation10 + $0xb8] sm:$0xff] }
 0x17b   :  { %1117 = vmatprep.subr.bf16.mxu1 %v1414_v0  ;;  %v1154_v16 = vpack.c.bf16 %v626_v14, %v624_v13  ;;  %v666_v12 = vld [vmem:[#allocation10 + $0x1d8] sm:$0xff]  ;;  %v663_v13 = vld [vmem:[#allocation10 + $0x1c0] sm:$0xff]  ;;  %v665_v14 = vld [vmem:[#allocation10 + $0x1d0] sm:$0xff] }
 0x17c   :  { %1111 = vmatprep.subr.bf16.mxu0 %v1110_v19  ;;  %v628_v19 = vld [vmem:[#allocation10 + $0xa8] sm:$0xff] }
 0x17d   :  { %1113 = vmatpush1.bf16.msra.mxu0 %v1112_v24  ;;  %v1158_v22 = vpack.c.bf16 %v630_v20, %v628_v19  ;;  %v629_v24 = vld [vmem:[#allocation10 + $0xb0] sm:$0xff]  ;;  %v667_v20 = vld [vmem:[#allocation10 + $0x1e0] sm:$0xff] }
 0x17e   :  { %1119 = vmatpush3.bf16.msra.mxu1 %v1118_v33  ;;  %1139 = vmatprep.subr.bf16.mxu0 %v1138_v28  ;;  %v1162_v28 = vpack.c.bf16 %v634_v27, %v632_v26  ;;  %v382_v26 = vlaneseq }
 0x17f   :  { %1120 = vmatprep.subr.bf16.mxu1 %v1414_v0 }
 0x180   :  { %v1578_v27 = vshrl.u32 %v382_v26, 7 }
 0x182   :  { %1122 = vmatpush3.bf16.msra.mxu1 %v1121_v44 }
 0x183   :  { %1123 = vmatprep.subr.bf16.mxu1 %v1414_v0 }
 0x186   :  { %1125 = vmatpush3.bf16.msra.mxu1 %v1124_v53  ;;  %v609_v53 = vld [vmem:[#allocation10 + $0x10] sm:$0xff] }
 0x187   :  { %1126 = vmatprep.subr.bf16.mxu1 %v1414_v0  ;;  %v1140_v58 = vpack.c.bf16 %v609_v53, %v607_v52  ;;  %v647_v52 = vld [vmem:[#allocation10 + $0x140] sm:$0xff]  ;;  %v649_v53 = vld [vmem:[#allocation10 + $0x150] sm:$0xff] }
 0x188   :  { %v1180_v54 = vpack.c.bf16 %v649_v53, %v647_v52 }
 0x18a   :  { %1128 = vmatpush3.bf16.msra.mxu1 %v1127_v62  ;;  %v613_v62 = vld [vmem:[#allocation10 + $0x30] sm:$0xff] }
 0x18b   :  { %1129 = vmatprep.subr.bf16.mxu1 %v1414_v0  ;;  %v1144_v3 = vpack.c.bf16 %v613_v62, %v611_v61  ;;  %v656_v61 = vld [vmem:[#allocation10 + $0x188] sm:$0xff]  ;;  %v658_v62 = vld [vmem:[#allocation10 + $0x198] sm:$0xff] }
 0x18c   :  { %v1186_v63 = vpack.c.bf16 %v658_v62, %v656_v61 }
 0x18e   :  { %1131 = vmatpush3.bf16.msra.mxu1 %v1130_v9  ;;  %v1148_v9 = vpack.c.bf16 %v617_v6, %v615_v5  ;;  %v660_v5 = vld [vmem:[#allocation10 + $0x1a8] sm:$0xff]  ;;  %v662_v6 = vld [vmem:[#allocation10 + $0x1b8] sm:$0xff] }
 0x18f   :  { %1132 = vmatprep.subr.bf16.mxu1 %v1414_v0  ;;  %v1190_v7 = vpack.c.bf16 %v662_v6, %v660_v5 }
 0x192   :  { %1134 = vmatpush3.bf16.msra.mxu1 %v1133_v18  ;;  %v625_v18 = vld [vmem:[#allocation10 + $0x90] sm:$0xff] }
 0x193   :  { %1135 = vmatprep.subr.bf16.mxu1 %v1414_v0  ;;  %v1156_v21 = vpack.c.bf16 %v625_v18, %v623_v17  ;;  %v670_v17 = vld [vmem:[#allocation10 + $0x1f8] sm:$0xff]  ;;  %v1196_v18 = vpack.c.bf16 %v665_v14, %v663_v13 }
 0x196   :  { %1137 = vmatpush3.bf16.msra.mxu1 %v1136_v25  ;;  %v1160_v25 = vpack.c.bf16 %v629_v24, %v627_v23  ;;  %v672_v23 = vld [vmem:[#allocation10 + $0x208] sm:$0xff]  ;;  %v674_v24 = vld [vmem:[#allocation10 + $0x218] sm:$0xff] }
 0x24c   :  { %v305_v30 = vpop.f32.mrb[2].mxu1 }
 0x24d   :  { %v306_v31 = vadd.f32 %v877_v29, %v305_v30  ;;  %v998_v32 = vpop.f32.mrb[3].mxu1  ;;  %v631_v29 = vld [vmem:[#allocation10 + $0xc0] sm:$0xff]  ;;  %v633_v30 = vld [vmem:[#allocation10 + $0xd0] sm:$0xff] }
 0x24e   :  { %v636_v32 = vld [vmem:[#allocation10 + $0xe8] sm:$0xff] }
 0x24f   :  { %v309_v33 = vmax.f32 %v306_v31, 0.0  ;;  %v1164_v31 = vpack.c.bf16 %v633_v30, %v631_v29  ;;  %v380_v29 = vld [vmem:[%s1642_s6] sm:$0x7]  ;;  %v388_v30 = vsub.s32 1, %v1578_v27 }
 0x251   :  { %v310_v34 = vrot.slane %v309_v33, 4  ;;  %v316_v35 = vmul.f32 %v309_v33, %v309_v33 }
 0x253   :  { %v311_v36 = vadd.f32 %v310_v34, %v309_v33  ;;  %v317_v37 = vrot.slane %v316_v35, 4 }
 0x255   :  { %v312_v38 = vrot.slane %v311_v36, 2  ;;  %v318_v0 = vadd.f32 %v317_v37, %v316_v35  ;;  %v635_v35 = vld [vmem:[#allocation10 + $0xe0] sm:$0xff] }
 0x257   :  { %v319_v39 = vrot.slane %v318_v0, 2  ;;  %v313_v40 = vadd.f32 %v312_v38, %v311_v36  ;;  %v637_v36 = vld [vmem:[#allocation10 + $0xf0] sm:$0xff]  ;;  %v640_v38 = vld [vmem:[#allocation10 + $0x108] sm:$0xff] }
 0x258   :  { %v1168_v37 = vpack.c.bf16 %v637_v36, %v635_v35 }
 0x259   :  { %v320_v41 = vadd.f32 %v319_v39, %v318_v0  ;;  %v314_v42 = vrot.slane %v313_v40, 1  ;;  %v642_v0 = vld [vmem:[#allocation10 + $0x118] sm:$0xff] }
 0x25a   :  { %v1170_v39 = vpack.c.bf16 %v642_v0, %v640_v38 }
 0x25b   :  { %v321_v43 = vrot.slane %v320_v41, 1  ;;  %v315_v44 = vadd.f32 %v314_v42, %v313_v40  ;;  %v639_v40 = vld [vmem:[#allocation10 + $0x100] sm:$0xff] }
 0x25d   :  { %v322_v45 = vadd.f32 %v321_v43, %v320_v41  ;;  %v323_v46 = vmul.f32 0.125, %v315_v44  ;;  %v641_v41 = vld [vmem:[#allocation10 + $0x110] sm:$0xff]  ;;  %v644_v43 = vld [vmem:[#allocation10 + $0x128] sm:$0xff]  ;;  %v646_v44 = vld [vmem:[#allocation10 + $0x138] sm:$0xff] }
 0x25e   :  { %v1172_v42 = vpack.c.bf16 %v641_v41, %v639_v40 }
 0x25f   :  { %v324_v47 = vmul.f32 0.125, %v322_v45  ;;  %v325_v48 = vmul.f32 %v323_v46, %v323_v46  ;;  %v328_v56 = vsub.f32 %v309_v33, %v323_v46  ;;  %v638_v33 = vld [vmem:[#allocation10 + $0xf8] sm:$0xff]  ;;  %v1174_v45 = vpack.c.bf16 %v646_v44, %v644_v43  ;;  %v643_v46 = vld [vmem:[#allocation10 + $0x120] sm:$0xff] }
 0x260   :  { %v1166_v34 = vpack.c.bf16 %v638_v33, %v636_v32  ;;  %v389_v32 = vrot.slane %v380_v29, %v388_v30 }
 0x261   :  { %v326_v49 = vsub.f32 %v324_v47, %v325_v48  ;;  %v645_v47 = vld [vmem:[#allocation10 + $0x130] sm:$0xff] }
 0x262   :  { %v1176_v48 = vpack.c.bf16 %v645_v47, %v643_v46 }
 0x263   :  { %v327_v50 = vmax.f32 %v326_v49, 0.0  ;;  %v648_v49 = vld [vmem:[#allocation10 + $0x148] sm:$0xff] }
 0x265   :  { %v329_v51 = vadd.f32 1e-05, %v327_v50  ;;  %v650_v50 = vld [vmem:[#allocation10 + $0x158] sm:$0xff] }
 0x267   :  { %1255 = vrsqrt.f32 %v329_v51  ;;  %v1178_v51 = vpack.c.bf16 %v650_v50, %v648_v49 }
 0x271   :  { %v1256_v57 = vpop.eup %1255 }
 0x272   :  { %v331_v59 = vmul.f32 %v1256_v57, %v328_v56  ;;  %v654_v56 = vld [vmem:[#allocation10 + $0x178] sm:$0xff] }
 0x273   :  { %v1182_v57 = vpack.c.bf16 %v654_v56, %v652_v55 }
 0x274   :  { %462 = vmatmul.mubr.f32.vlgmr.msra.gmra.mrb[0].mxu0 %v331_v59  ;;  %1032 = vmatmul.mubr.f32.vlgmr.msra.gmra.mrb[4].mxu1 %v331_v59  ;;  %v653_v59 = vld [vmem:[#allocation10 + $0x170] sm:$0xff] }
 0x275   :  { %1141 = vmatpush1.bf16.msra.mxu0 %v1140_v58  ;;  %v651_v58 = vld [vmem:[#allocation10 + $0x160] sm:$0xff] }
 0x276   :  { %1143 = vmatprep.subr.bf16.mxu0 %v1142_v60  ;;  %v1184_v60 = vpack.c.bf16 %v653_v59, %v651_v58 }
 0x279   :  { %1145 = vmatpush1.bf16.msra.mxu0 %v1144_v3  ;;  %v657_v3 = vld [vmem:[#allocation10 + $0x190] sm:$0xff] }
 0x27a   :  { %1147 = vmatprep.subr.bf16.mxu0 %v1146_v4  ;;  %v1188_v4 = vpack.c.bf16 %v657_v3, %v655_v2 }
 0x27d   :  { %1149 = vmatpush1.bf16.msra.mxu0 %v1148_v9  ;;  %v661_v9 = vld [vmem:[#allocation10 + $0x1b0] sm:$0xff] }
 0x27e   :  { %1151 = vmatprep.subr.bf16.mxu0 %v1150_v10  ;;  %v664_v10 = vld [vmem:[#allocation10 + $0x1c8] sm:$0xff]  ;;  %v1192_v11 = vpack.c.bf16 %v661_v9, %v659_v8 }
 0x281   :  { %1153 = vmatpush1.bf16.msra.mxu0 %v1152_v15  ;;  %v1194_v15 = vpack.c.bf16 %v666_v12, %v664_v10 }
 0x282   :  { %1155 = vmatprep.subr.bf16.mxu0 %v1154_v16  ;;  %v668_v16 = vld [vmem:[#allocation10 + $0x1e8] sm:$0xff] }
 0x283   :  { %v1198_v19 = vpack.c.bf16 %v670_v17, %v668_v16 }
 0x285   :  { %1157 = vmatpush1.bf16.msra.mxu0 %v1156_v21  ;;  %v669_v21 = vld [vmem:[#allocation10 + $0x1f0] sm:$0xff] }
 0x286   :  { %1159 = vmatprep.subr.bf16.mxu0 %v1158_v22  ;;  %v1200_v22 = vpack.c.bf16 %v669_v21, %v667_v20 }
 0x289   :  { %1161 = vmatpush1.bf16.msra.mxu0 %v1160_v25  ;;  %v1202_v25 = vpack.c.bf16 %v674_v24, %v672_v23 }
 0x28a   :  { %1163 = vmatprep.subr.bf16.mxu0 %v1162_v28  ;;  %v384_v28 = vsub.s32 0, %v1578_v27 }
 0x28d   :  { %1165 = vmatpush1.bf16.msra.mxu0 %v1164_v31  ;;  %v385_v31 = vrot.slane %v380_v29, %v384_v28 }
 0x28e   :  { %1167 = vmatprep.subr.bf16.mxu0 %v1166_v34  ;;  %v392_v34 = vsub.s32 2, %v1578_v27 }
 0x290   :  { %v393_v40 = vrot.slane %v380_v29, %v392_v34 }
 0x291   :  { %1169 = vmatpush1.bf16.msra.mxu0 %v1168_v37 }
 0x292   :  { %1171 = vmatprep.subr.bf16.mxu0 %v1170_v39 }
 0x295   :  { %1173 = vmatpush1.bf16.msra.mxu0 %v1172_v42 }
 0x296   :  { %1175 = vmatprep.subr.bf16.mxu0 %v1174_v45 }
 0x299   :  { %1177 = vmatpush1.bf16.msra.mxu0 %v1176_v48 }
 0x29a   :  { %1179 = vmatprep.subr.bf16.mxu0 %v1178_v51 }
 0x29d   :  { %1181 = vmatpush1.bf16.msra.mxu0 %v1180_v54 }
 0x29e   :  { %1183 = vmatprep.subr.bf16.mxu0 %v1182_v57 }
 0x2a1   :  { %1185 = vmatpush1.bf16.msra.mxu0 %v1184_v60 }
 0x2a2   :  { %1187 = vmatprep.subr.bf16.mxu0 %v1186_v63 }
 0x2a5   :  { %1189 = vmatpush1.bf16.msra.mxu0 %v1188_v4 }
 0x2a6   :  { %1191 = vmatprep.subr.bf16.mxu0 %v1190_v7 }
 0x2a9   :  { %1193 = vmatpush1.bf16.msra.mxu0 %v1192_v11 }
 0x2aa   :  { %1195 = vmatprep.subr.bf16.mxu0 %v1194_v15 }
 0x2ad   :  { %1197 = vmatpush1.bf16.msra.mxu0 %v1196_v18 }
 0x2ae   :  { %1199 = vmatprep.subr.bf16.mxu0 %v1198_v19 }
 0x2b1   :  { %1201 = vmatpush1.bf16.msra.mxu0 %v1200_v22 }
 0x2b2   :  { %1203 = vmatprep.subr.bf16.mxu0 %v1202_v25 }
 0x347   :  { %v463_v33 = vpop.f32.mrb[0].mxu0  ;;  %v534_v35 = vpop.f32.mrb[4].mxu1 }
 0x348   :  { %v464_v36 = vadd.f32 %v463_v33, %v385_v31  ;;  %v465_v37 = vpop.f32.mrb[1].mxu0  ;;  %v1033_v38 = vpop.f32.mrb[5].mxu1  ;;  %v535_v48 = vadd.f32 %v534_v35, %v393_v40  ;;  %v671_v35 = vld [vmem:[#allocation10 + $0x200] sm:$0xff]  ;;  %v678_v40 = vld [vmem:[#allocation10 + $0x238] sm:$0xff] }
 0x349   :  { %v466_v0 = vadd.f32 %v465_v37, %v389_v32 }
 0x34a   :  { %v1590_v39 = vmax.f32 %v464_v36, 0.0  ;;  %v1602_v57 = vmax.f32 %v535_v48, 0.0  ;;  %v673_v36 = vld [vmem:[#allocation10 + $0x210] sm:$0xff] }
 0x34b   :  { %v1592_v41 = vmax.f32 %v466_v0, 0.0  ;;  %v676_v0 = vld [vmem:[#allocation10 + $0x228] sm:$0xff] }
 0x34c   :  { %v541_v42 = vrot.slane %v1590_v39, 4  ;;  %v559_v43 = vmul.f32 %v1590_v39, %v1590_v39  ;;  %v553_v4 = vrot.slane %v1602_v57, 4  ;;  %v561_v5 = vmul.f32 %v1602_v57, %v1602_v57 }
 0x34d   :  { %v547_v44 = vrot.slane %v1592_v41, 4  ;;  %v560_v45 = vmul.f32 %v1592_v41, %v1592_v41 }
 0x34e   :  { %v542_v46 = vadd.f32 %v541_v42, %v1590_v39  ;;  %v562_v47 = vrot.slane %v559_v43, 4  ;;  %v554_v14 = vadd.f32 %v553_v4, %v1602_v57  ;;  %v574_v15 = vrot.slane %v561_v5, 4  ;;  %v688_v4 = vld [vmem:[#allocation10 + $0x288] sm:$0xff] }
 0x34f   :  { %v548_v49 = vadd.f32 %v547_v44, %v1592_v41  ;;  %v568_v50 = vrot.slane %v560_v45, 4 }
 0x350   :  { %v543_v51 = vrot.slane %v542_v46, 2  ;;  %v563_v52 = vadd.f32 %v562_v47, %v559_v43  ;;  %v555_v21 = vrot.slane %v554_v14, 2  ;;  %v575_v22 = vadd.f32 %v574_v15, %v561_v5  ;;  %v690_v5 = vld [vmem:[#allocation10 + $0x298] sm:$0xff]  ;;  %v691_v15 = vld [vmem:[#allocation10 + $0x2a0] sm:$0xff] }
 0x351   :  { %v549_v53 = vrot.slane %v548_v49, 2  ;;  %v569_v54 = vadd.f32 %v568_v50, %v560_v45  ;;  %v1204_v47 = vpack.c.bf16 %v673_v36, %v671_v35  ;;  %v675_v50 = vld [vmem:[#allocation10 + $0x220] sm:$0xff]  ;;  %v703_v36 = vld [vmem:[%s1644_s8] sm:$0x3] }
 0x352   :  { %v544_v55 = vadd.f32 %v543_v51, %v542_v46  ;;  %v564_v56 = vrot.slane %v563_v52, 2  ;;  %v556_v26 = vadd.f32 %v555_v21, %v554_v14  ;;  %v576_v29 = vrot.slane %v575_v22, 2  ;;  %v677_v51 = vld [vmem:[#allocation10 + $0x230] sm:$0xff]  ;;  %v695_v21 = vld [vmem:[#allocation10 + $0x2c0] sm:$0xff] }
 0x353   :  { %v570_v58 = vrot.slane %v569_v54, 2  ;;  %v550_v59 = vadd.f32 %v549_v53, %v548_v49  ;;  %v1206_v49 = vpack.c.bf16 %v678_v40, %v676_v0  ;;  %v682_v53 = vld [vmem:[#allocation10 + $0x258] sm:$0xff] }
 0x354   :  { %v545_v60 = vrot.slane %v544_v55, 1  ;;  %v565_v61 = vadd.f32 %v564_v56, %v563_v52  ;;  %v557_v31 = vrot.slane %v556_v26, 1  ;;  %v577_v32 = vadd.f32 %v576_v29, %v575_v22  ;;  %v680_v52 = vld [vmem:[#allocation10 + $0x248] sm:$0xff]  ;;  %v679_v56 = vld [vmem:[#allocation10 + $0x240] sm:$0xff]  ;;  %v697_v22 = vld [vmem:[#allocation10 + $0x2d0] sm:$0xff] }
 0x355   :  { %v571_v62 = vadd.f32 %v570_v58, %v569_v54  ;;  %v551_v63 = vrot.slane %v550_v59, 1  ;;  %v681_v58 = vld [vmem:[#allocation10 + $0x250] sm:$0xff]  ;;  %v699_v29 = vld [vmem:[#allocation10 + $0x2e0] sm:$0xff] }
 0x356   :  { %v546_v2 = vadd.f32 %v545_v60, %v544_v55  ;;  %v566_v3 = vrot.slane %v565_v61, 1  ;;  %v558_v33 = vadd.f32 %v557_v31, %v556_v26  ;;  %v578_v34 = vrot.slane %v577_v32, 1  ;;  %v686_v60 = vld [vmem:[#allocation10 + $0x278] sm:$0xff]  ;;  %v701_v31 = vld [vmem:[#allocation10 + $0x2f0] sm:$0xff] }
 0x357   :  { %v572_v6 = vrot.slane %v571_v62, 1  ;;  %v552_v7 = vadd.f32 %v551_v63, %v550_v59  ;;  %v1208_v55 = vpack.c.bf16 %v677_v51, %v675_v50  ;;  %v684_v59 = vld [vmem:[#allocation10 + $0x268] sm:$0xff] }
 0x358   :  { %v567_v8 = vadd.f32 %v566_v3, %v565_v61  ;;  %v580_v9 = vmul.f32 0.125, %v546_v2  ;;  %v579_v44 = vadd.f32 %v578_v34, %v577_v32  ;;  %v1610_v45 = vmul.f32 0.125, %v558_v33  ;;  %v683_v2 = vld [vmem:[#allocation10 + $0x260] sm:$0xff]  ;;  %v685_v3 = vld [vmem:[#allocation10 + $0x270] sm:$0xff] }
 0x359   :  { %v573_v10 = vadd.f32 %v572_v6, %v571_v62  ;;  %v581_v11 = vmul.f32 0.125, %v552_v7  ;;  %v1212_v62 = vpack.c.bf16 %v681_v58, %v679_v56  ;;  %v1214_v63 = vpack.c.bf16 %v686_v60, %v684_v59 }
 0x35a   :  { %v583_v12 = vmul.f32 0.125, %v567_v8  ;;  %v586_v13 = vmul.f32 %v580_v9, %v580_v9  ;;  %v595_v43 = vsub.f32 %v1590_v39, %v580_v9  ;;  %v585_v54 = vmul.f32 0.125, %v579_v44  ;;  %v687_v8 = vld [vmem:[#allocation10 + $0x280] sm:$0xff]  ;;  %v689_v9 = vld [vmem:[#allocation10 + $0x290] sm:$0xff] }
 0x35b   :  { %v584_v16 = vmul.f32 0.125, %v573_v10  ;;  %v587_v17 = vmul.f32 %v581_v11, %v581_v11  ;;  %v596_v38 = vsub.f32 %v1592_v41, %v581_v11  ;;  %v588_v41 = vmul.f32 %v1610_v45, %v1610_v45  ;;  %v692_v10 = vld [vmem:[#allocation10 + $0x2a8] sm:$0xff]  ;;  %v694_v11 = vld [vmem:[#allocation10 + $0x2b8] sm:$0xff] }
 0x35c   :  { %v589_v18 = vsub.f32 %v583_v12, %v586_v13  ;;  %v1210_v39 = vpack.c.bf16 %v682_v53, %v680_v52  ;;  %v1216_v7 = vpack.c.bf16 %v685_v3, %v683_v2  ;;  %v1220_v13 = vpack.c.bf16 %v689_v9, %v687_v8 }
 0x35d   :  { %v590_v19 = vsub.f32 %v584_v16, %v587_v17  ;;  %v591_v61 = vsub.f32 %v585_v54, %v588_v41  ;;  %v1222_v14 = vpack.c.bf16 %v694_v11, %v692_v10  ;;  %v693_v16 = vld [vmem:[#allocation10 + $0x2b0] sm:$0xff]  ;;  %v696_v17 = vld [vmem:[#allocation10 + $0x2c8] sm:$0xff]  ;;  %v1232_v32 = vpack.c.bf16 %v701_v31, %v699_v29 }
 0x35e   :  { %v592_v20 = vmax.f32 %v589_v18, 0.0  ;;  %v698_v18 = vld [vmem:[#allocation10 + $0x2d8] sm:$0xff]  ;;  %v597_v34 = vsub.f32 %v1602_v57, %v1610_v45 }
 0x35f   :  { %v593_v23 = vmax.f32 %v590_v19, 0.0  ;;  %v594_v6 = vmax.f32 %v591_v61, 0.0  ;;  %v1224_v19 = vpack.c.bf16 %v693_v16, %v691_v15 }
 0x360   :  { %v598_v24 = vadd.f32 1e-05, %v592_v20  ;;  %v1226_v20 = vpack.c.bf16 %v698_v18, %v696_v17 }
 0x361   :  { %v599_v25 = vadd.f32 1e-05, %v593_v23  ;;  %v600_v12 = vadd.f32 1e-05, %v594_v6  ;;  %v700_v23 = vld [vmem:[#allocation10 + $0x2e8] sm:$0xff] }
 0x362   :  { %1257 = vrsqrt.f32 %v598_v24  ;;  %v702_v24 = vld [vmem:[#allocation10 + $0x2f8] sm:$0xff] }
 0x363   :  { %1259 = vrsqrt.f32 %v599_v25  ;;  %v1228_v25 = vpack.c.bf16 %v697_v22, %v695_v21  ;;  %v1230_v26 = vpack.c.bf16 %v702_v24, %v700_v23 }
 0x364   :  { %1261 = vrsqrt.f32 %v600_v12 }
 0x36c   :  { %v1258_v37 = vpop.eup %1257 }
 0x36d   :  { %v1260_v42 = vpop.eup %1259  ;;  %v604_v48 = vmul.f32 %v1258_v37, %v595_v43  ;;  %v708_v37 = vrot.slane %v703_v36, %v384_v28 }
 0x36e   :  { %v605_v46 = vmul.f32 %v1260_v42, %v596_v38  ;;  %v1262_v33 = vpop.eup %1261  ;;  %v712_v38 = vrot.slane %v703_v36, %v388_v30 }
 0x36f   :  { %v606_v35 = vmul.f32 %v1262_v33, %v597_v34 }
 0x370   :  { %779 = vmatprep.mubr.f32.mxu0 %v605_v46 }
 0x371   :  { %780 = vmatmul.mubr.f32.vlgmr.msra.gmra.mrb[2].mxu0 %v604_v48 }
 0x372   :  { %1205 = vmatpush1.bf16.msra.mxu0 %v1204_v47  ;;  %850 = vmatprep.mubr.f32.mxu0 %v1416_v1  ;;  %v1218_v1 = vpack.c.bf16 %v690_v5, %v688_v4 }
 0x373   :  { %1207 = vmatprep.subr.bf16.mxu0 %v1206_v49 }
 0x376   :  { %1209 = vmatpush1.bf16.msra.mxu0 %v1208_v55 }
 0x377   :  { %1211 = vmatprep.subr.bf16.mxu0 %v1210_v39 }
 0x37a   :  { %1213 = vmatpush1.bf16.msra.mxu0 %v1212_v62 }
 0x37b   :  { %1215 = vmatprep.subr.bf16.mxu0 %v1214_v63 }
 0x37e   :  { %1217 = vmatpush1.bf16.msra.mxu0 %v1216_v7 }
 0x37f   :  { %1219 = vmatprep.subr.bf16.mxu0 %v1218_v1 }
 0x382   :  { %1221 = vmatpush1.bf16.msra.mxu0 %v1220_v13 }
 0x383   :  { %1223 = vmatprep.subr.bf16.mxu0 %v1222_v14 }
 0x386   :  { %1225 = vmatpush1.bf16.msra.mxu0 %v1224_v19 }
 0x387   :  { %1227 = vmatprep.subr.bf16.mxu0 %v1226_v20 }
 0x38a   :  { %1229 = vmatpush1.bf16.msra.mxu0 %v1228_v25 }
 0x38b   :  { %1231 = vmatprep.subr.bf16.mxu0 %v1230_v26 }
 0x38e   :  { %1233 = vmatpush1.bf16.msra.mxu0 %v1232_v32 }
 0x391   :  { %851 = vmatmul.mubr.f32.vlgmr.msra.gmra.mrb[2].mxu0 %v606_v35 }
 0x464   :  { %v852_v0 = vpop.f32.mrb[2].mxu0 }
 0x465   :  { %v1234_v40 = vadd.f32 %v852_v0, %v708_v37  ;;  %v854_v42 = vpop.f32.mrb[3].mxu0 }
 0x466   :  { %v1235_v43 = vadd.f32 %v854_v42, %v712_v38 }
 0x467   :  { %857 = vst [vmem:[#allocation11] sm:$0xff] %v1234_v40 }
 0x468   :  { %858 = vst [vmem:[#allocation11 + $0x8] sm:$0xff] %v1235_v43 }
 0x469   :  { %1384 = shalt.err (!%p1381_p2)
}
 0x46a   :  { %s1385_s15 = scalar_lea.hbm %s1645_s9, 256 }
 0x46b   :  { %p1386_p3 = scmp.ne.s32.totalorder %s1645_s9, %s1385_s15  ;;  %p1389_p4 = scmp.lt.u32.totalorder %s1385_s15, %s1645_s9 }
 0x46d   :  { %p1391_p5 = pnand %p1389_p4, %p1386_p3 }
 0x46f   :  { %1394 = shalt.err (!%p1391_p5)
}
 0x470   :  { %868 = dma.vmem_to_hbm [thread:$0]  %s866_s10, 256, %s1645_s9, [#allocation4]  }
 0x471   :  { %1401 = dma.done.wait [#allocation4], 256  }
 0x472   :  { %1402 = vsyncadd [#allocation4], 4294967040 }
 0x473   :  { %872 = vsyncpa [#allocation3], 1 }
 0x474   :  { %873 = vsyncpa [#allocation6], 1 }
 0x475   :  { %874 = vsyncpa [#allocation9], 1 }
 0x476   :  { %875 = vsyncpa [#allocation4], 1 }

</bundles_post_ra>
